<compile_context>
chip_gen: v7x
topology: tpu7x:2x2x1
jax: 0.10.0
libtpu: 0.0.40
codegen_flags: <defaults>
</compile_context>

<pallas_src>
import functools

import jax
import jax.numpy as jnp
from jax.experimental import pallas as pl
from jax.experimental.pallas import tpu as pltpu

LANE = 128


def _round_up(n, m):
    return ((n + m - 1) // m) * m


def _cdiv(a, b):
    return (a + b - 1) // b


# ----------------------------------------------------------------------------
# Kernel body: fused (x @ W1 + b1).relu @ W2 + b2).relu @ W3 + b3).relu
# ----------------------------------------------------------------------------
def dnn_kernel(x_ref, w1_ref, b1_ref, w2_ref, b2_ref, w3_ref, b3_ref, o_ref):
    # Cast activations to the weight dtype (no-op for f32; on the bf16 path it
    # keeps MXU operands bf16 while accumulating in f32).
    x = x_ref[...].astype(w1_ref.dtype)

    # fc1 + ReLU  (f32 MXU accumulation, f32 bias add)
    h1 = jnp.dot(x, w1_ref[...], preferred_element_type=jnp.float32)
    h1 = jnp.maximum(h1 + b1_ref[...], 0.0)

    # fc2 + ReLU
    h2 = jnp.dot(h1.astype(w2_ref.dtype), w2_ref[...],
                 preferred_element_type=jnp.float32)
    h2 = jnp.maximum(h2 + b2_ref[...], 0.0)

    # fc3 + ReLU
    h3 = jnp.dot(h2.astype(w3_ref.dtype), w3_ref[...],
                 preferred_element_type=jnp.float32)
    h3 = jnp.maximum(h3 + b3_ref[...], 0.0)

    o_ref[...] = h3.astype(o_ref.dtype)


# ----------------------------------------------------------------------------
# Jitted implementation (all shape/tiling decisions are static Python ints)
# ----------------------------------------------------------------------------
@functools.partial(
    jax.jit,
    static_argnames=("out_dim", "tile_b", "slice_output", "out_dtype"))
def _dnn_forward_impl(x, w1, b1, w2, b2, w3, b3, *,
                      out_dim, tile_b, slice_output, out_dtype):
    B, in_dim = x.shape
    hid_pad = w1.shape[1]
    out_pad = w3.shape[1]

    # ---- batch-tile selection: nearly divide B, keep tiles 8-aligned -------
    n_tiles = max(1, _cdiv(B, max(int(tile_b), 8)))
    if n_tiles > 1 and n_tiles % 2 == 1:
        n_tiles += 1          # even tile count -> balanced v7x megacore split
    tb = _round_up(_cdiv(B, n_tiles), 8)
    B_pad = n_tiles * tb      # minimal padding (<= n_tiles*8 - 1 extra rows)
    if B_pad != B:
        x = jnp.pad(x, ((0, B_pad - B), (0, 0)))

    # ---- VMEM budget / cost hints ------------------------------------------
    x_bytes = x.dtype.itemsize
    o_bytes = jnp.dtype(out_dtype).itemsize
    param_bytes = (w1.size * w1.dtype.itemsize + w2.size * w2.dtype.itemsize +
                   w3.size * w3.dtype.itemsize +
                   b1.size * b1.dtype.itemsize + b2.size * b2.dtype.itemsize +
                   b3.size * b3.dtype.itemsize)
    vmem_est = (2 * tb * in_dim * x_bytes      # double-buffered x tiles
                + 2 * tb * out_pad * o_bytes   # double-buffered out tiles
                + 2 * tb * hid_pad * 4         # f32 h1/h2 intermediates
                + 2 * param_bytes)             # resident weights/biases
    # Floor above v5e's 16 MiB scoped default, cap below v7x's 64 MiB physical.
    vmem_limit = min(max(2 * vmem_est, 32 * 1024 * 1024), 64 * 1024 * 1024)

    flops = 2 * B_pad * (in_dim * hid_pad + hid_pad * hid_pad +
                         hid_pad * out_pad)
    bytes_accessed = (B_pad * in_dim * x_bytes +
                      B_pad * out_pad * o_bytes + param_bytes)
    cost = pl.CostEstimate(flops=flops, transcendentals=0,
                           bytes_accessed=bytes_accessed)

    # ---- specs ---------------------------------------------------------------
    x_spec = pl.BlockSpec((tb, in_dim), lambda i: (i, 0))
    out_spec = pl.BlockSpec((tb, out_pad), lambda i: (i, 0))
    # Constant block index => weights/biases stay VMEM-resident across tiles.
    const = lambda shape: pl.BlockSpec(shape, lambda i: (0, 0))

    out = pl.pallas_call(
        dnn_kernel,
        out_shape=jax.ShapeDtypeStruct((B_pad, out_pad), out_dtype),
        grid=(n_tiles,),
        in_specs=[
            x_spec,
            const(w1.shape), const(b1.shape),
            const(w2.shape), const(b2.shape),
            const(w3.shape), const(b3.shape),
        ],
        out_specs=out_spec,
        compiler_params=pltpu.CompilerParams(
            dimension_semantics=("parallel",),
            vmem_limit_bytes=int(vmem_limit)),
        cost_estimate=cost,
    )(x, w1, b1, w2, b2, w3, b3)

    if slice_output:
        # B and out_dim are static Python ints here, so this is a static slice.
        out = out[:B, :out_dim]
    return out


# ----------------------------------------------------------------------------
# Public wrapper (non-jitted): pulls static config out of the params pytree.
# ----------------------------------------------------------------------------
def dnn_forward(x, params, *, tile_b=2048, slice_output=True, out_dtype=None):
    """x: (B, input_dim). params: dict from init_dnn_params.

    Returns (B, output_dim) if slice_output else the lane-padded (B_pad, 128)
    block (lets a downstream consumer fuse the slice instead of paying an
    extra HBM pass).  Output dtype defaults to bf16 on the bf16-weight path,
    f32 otherwise; override with out_dtype.
    """
    out_dim = int(params["out_dim"])
    w1 = params["w1"]
    if out_dtype is None:
        out_dtype = jnp.bfloat16 if w1.dtype == jnp.bfloat16 else jnp.float32
    return _dnn_forward_impl(
        x, w1, params["b1"], params["w2"], params["b2"],
        params["w3"], params["b3"],
        out_dim=out_dim, tile_b=int(tile_b),
        slice_output=bool(slice_output), out_dtype=jnp.dtype(out_dtype))


# ----------------------------------------------------------------------------
# Params init (PyTorch nn.Linear-style), feature dims zero-padded to 128 lanes.
# Zero pads are inert through matmul + bias + ReLU (ReLU(0) = 0).
# ----------------------------------------------------------------------------
def init_dnn_params(key, input_dim, output_dim, hidden=100,
                    param_dtype=jnp.float32):
    keys = jax.random.split(key, 6)
    hidden_pad = _round_up(hidden, LANE)
    out_pad = _round_up(output_dim, LANE)

    def linear(kw, kb, fan_in, fan_out, rows_pad, cols_pad):
        bound = 1.0 / float(fan_in) ** 0.5
        w = jax.random.uniform(kw, (fan_in, fan_out), jnp.float32, -bound, bound)
        b = jax.random.uniform(kb, (1, fan_out), jnp.float32, -bound, bound)
        w = jnp.pad(w, ((0, rows_pad - fan_in), (0, cols_pad - fan_out)))
        b = jnp.pad(b, ((0, 0), (0, cols_pad - fan_out)))
        return w.astype(param_dtype), b  # biases kept f32

    w1, b1 = linear(keys[0], keys[1], input_dim, hidden, input_dim, hidden_pad)
    w2, b2 = linear(keys[2], keys[3], hidden, hidden, hidden_pad, hidden_pad)
    w3, b3 = linear(keys[4], keys[5], hidden, output_dim, hidden_pad, out_pad)
    return {"w1": w1, "b1": b1, "w2": w2, "b2": b2, "w3": w3, "b3": b3,
            "out_dim": int(output_dim)}


def dnn_reference(x, params):
    """Plain-JAX reference matching the kernel's precision behavior."""
    h = x
    for wn, bn in (("w1", "b1"), ("w2", "b2"), ("w3", "b3")):
        w, b = params[wn], params[bn]
        h = jnp.dot(h.astype(w.dtype), w, preferred_element_type=jnp.float32)
        h = jnp.maximum(h + b, 0.0)
    return h[:, :params["out_dim"]]


if __name__ == "__main__":
    input_dim = 32
    output_dim = 10

    key = jax.random.PRNGKey(0)
    k_params, k_x1, k_x2 = jax.random.split(key, 3)

    # ---- f32 path, small batch (single tile) --------------------------------
    params_f32 = init_dnn_params(k_params, input_dim, output_dim)
    x_small = jax.random.normal(k_x1, (8, input_dim), jnp.float32)
    out_small = jax.block_until_ready(dnn_forward(x_small, params_f32))
    assert out_small.shape == (8, output_dim)
    assert bool(jnp.all(out_small >= 0.0))
    ref_small = dnn_reference(x_small, params_f32)
    assert bool(jnp.allclose(out_small, ref_small, atol=1e-5, rtol=1e-5))

    # ---- f32 path, non-multiple batch with a small tile (multi-step grid,
    #      near-divisor tb => minimal padding, even tile count) ---------------
    x_big = jax.random.normal(k_x2, (600, input_dim), jnp.float32)
    out_big = jax.block_until_ready(dnn_forward(x_big, params_f32, tile_b=256))
    assert out_big.shape == (600, output_dim)
    ref_big = dnn_reference(x_big, params_f32)
    assert bool(jnp.allclose(out_big, ref_big, atol=1e-5, rtol=1e-5))

    # ---- deferred-slice (lane-padded) output path ----------------------------
    out_padded = jax.block_until_ready(
        dnn_forward(x_big, params_f32, tile_b=256, slice_output=False))
    assert out_padded.shape[1] == LANE
    assert bool(jnp.allclose(out_padded[:600, :output_dim], ref_big,
                             atol=1e-5, rtol=1e-5))

    # ---- bf16 weights + bf16 activations/output (v5e/v6e MXU & HBM friendly)
    params_bf16 = init_dnn_params(k_params, input_dim, output_dim,
                                  param_dtype=jnp.bfloat16)
    x_bf16 = x_small.astype(jnp.bfloat16)          # producer emits bf16 x
    out_bf16 = jax.block_until_ready(dnn_forward(x_bf16, params_bf16))
    assert out_bf16.shape == (8, output_dim)
    assert out_bf16.dtype == jnp.bfloat16
    ref_bf16 = dnn_reference(x_bf16, params_bf16)
    assert bool(jnp.allclose(out_bf16.astype(jnp.float32),
                             ref_bf16.astype(jnp.float32),
                             atol=3e-2, rtol=3e-2))

    print("KERNEL_OK")
</pallas_src>

<mosaic_0001>
module attributes {stable_mosaic.version = 11 : i64} {
  func.func @dnn_kernel(%arg0: i32, %arg1: memref<8x32xf32, #tpu.memory_space<vmem>>, %arg2: memref<32x128xf32, #tpu.memory_space<vmem>>, %arg3: memref<1x128xf32, #tpu.memory_space<vmem>>, %arg4: memref<128x128xf32, #tpu.memory_space<vmem>>, %arg5: memref<1x128xf32, #tpu.memory_space<vmem>>, %arg6: memref<128x128xf32, #tpu.memory_space<vmem>>, %arg7: memref<1x128xf32, #tpu.memory_space<vmem>>, %arg8: memref<8x128xf32, #tpu.memory_space<vmem>>) attributes {dimension_semantics = [#tpu.dimension_semantics<parallel>], iteration_bounds = array<i64: 1>, scalar_prefetch = 0 : i64, scratch_operands = 0 : i64, tpu.core_type = #tpu.core_type<tc>, window_params = [{transform_indices = @transform_0, window_bounds = array<i64: 8, 32>}, {pipeline_mode = #tpu.pipeline_mode<synchronous>, transform_indices = @transform_1, window_bounds = array<i64: 32, 128>}, {pipeline_mode = #tpu.pipeline_mode<synchronous>, transform_indices = @transform_2, window_bounds = array<i64: 1, 128>}, {pipeline_mode = #tpu.pipeline_mode<synchronous>, transform_indices = @transform_3, window_bounds = array<i64: 128, 128>}, {pipeline_mode = #tpu.pipeline_mode<synchronous>, transform_indices = @transform_4, window_bounds = array<i64: 1, 128>}, {pipeline_mode = #tpu.pipeline_mode<synchronous>, transform_indices = @transform_5, window_bounds = array<i64: 128, 128>}, {pipeline_mode = #tpu.pipeline_mode<synchronous>, transform_indices = @transform_6, window_bounds = array<i64: 1, 128>}, {transform_indices = @transform_7, window_bounds = array<i64: 8, 128>}]} {
    %c0 = arith.constant 0 : index
    %c0_0 = arith.constant 0 : index
    %0 = vector.load %arg1[%c0, %c0_0] : memref<8x32xf32, #tpu.memory_space<vmem>>, vector<8x32xf32>
    %c0_1 = arith.constant 0 : index
    %c0_2 = arith.constant 0 : index
    %1 = vector.load %arg2[%c0_1, %c0_2] : memref<32x128xf32, #tpu.memory_space<vmem>>, vector<32x128xf32>
    %cst = arith.constant dense<0.000000e+00> : vector<8x128xf32>
    %2 = tpu.matmul %0, %1, %cst {dimension_numbers = #tpu.dot_dimension_numbers<[1], [0], [0], [1], [0, 0, 1, 1], [], []>} : vector<8x32xf32>, vector<32x128xf32>, vector<8x128xf32> -> vector<8x128xf32>
    %c0_3 = arith.constant 0 : index
    %c0_4 = arith.constant 0 : index
    %3 = vector.load %arg3[%c0_3, %c0_4] : memref<1x128xf32, #tpu.memory_space<vmem>>, vector<1x128xf32>
    %4 = vector.broadcast %3 : vector<1x128xf32> to vector<8x128xf32>
    %5 = arith.addf %2, %4 : vector<8x128xf32>
    %cst_5 = arith.constant 0.000000e+00 : f32
    %6 = vector.broadcast %cst_5 : f32 to vector<8x128xf32>
    %7 = arith.maximumf %5, %6 : vector<8x128xf32>
    %c0_6 = arith.constant 0 : index
    %c0_7 = arith.constant 0 : index
    %8 = vector.load %arg4[%c0_6, %c0_7] : memref<128x128xf32, #tpu.memory_space<vmem>>, vector<128x128xf32>
    %cst_8 = arith.constant dense<0.000000e+00> : vector<8x128xf32>
    %9 = tpu.matmul %7, %8, %cst_8 {dimension_numbers = #tpu.dot_dimension_numbers<[1], [0], [0], [1], [0, 0, 1, 1], [], []>} : vector<8x128xf32>, vector<128x128xf32>, vector<8x128xf32> -> vector<8x128xf32>
    %c0_9 = arith.constant 0 : index
    %c0_10 = arith.constant 0 : index
    %10 = vector.load %arg5[%c0_9, %c0_10] : memref<1x128xf32, #tpu.memory_space<vmem>>, vector<1x128xf32>
    %11 = vector.broadcast %10 : vector<1x128xf32> to vector<8x128xf32>
    %12 = arith.addf %9, %11 : vector<8x128xf32>
    %cst_11 = arith.constant 0.000000e+00 : f32
    %13 = vector.broadcast %cst_11 : f32 to vector<8x128xf32>
    %14 = arith.maximumf %12, %13 : vector<8x128xf32>
    %c0_12 = arith.constant 0 : index
    %c0_13 = arith.constant 0 : index
    %15 = vector.load %arg6[%c0_12, %c0_13] : memref<128x128xf32, #tpu.memory_space<vmem>>, vector<128x128xf32>
    %cst_14 = arith.constant dense<0.000000e+00> : vector<8x128xf32>
    %16 = tpu.matmul %14, %15, %cst_14 {dimension_numbers = #tpu.dot_dimension_numbers<[1], [0], [0], [1], [0, 0, 1, 1], [], []>} : vector<8x128xf32>, vector<128x128xf32>, vector<8x128xf32> -> vector<8x128xf32>
    %c0_15 = arith.constant 0 : index
    %c0_16 = arith.constant 0 : index
    %17 = vector.load %arg7[%c0_15, %c0_16] : memref<1x128xf32, #tpu.memory_space<vmem>>, vector<1x128xf32>
    %18 = vector.broadcast %17 : vector<1x128xf32> to vector<8x128xf32>
    %19 = arith.addf %16, %18 : vector<8x128xf32>
    %cst_17 = arith.constant 0.000000e+00 : f32
    %20 = vector.broadcast %cst_17 : f32 to vector<8x128xf32>
    %21 = arith.maximumf %19, %20 : vector<8x128xf32>
    %c0_18 = arith.constant 0 : index
    %c0_19 = arith.constant 0 : index
    %22 = vector.load %arg8[%c0_18, %c0_19] : memref<8x128xf32, #tpu.memory_space<vmem>>, vector<8x128xf32>
    tpu.vector_store %arg8[%c0_18, %c0_19], %21 {strides = array<i32>} : memref<8x128xf32, #tpu.memory_space<vmem>>, vector<8x128xf32>,
    return
  }
  func.func @transform_0(%arg0: i32) -> (i32, i32) {
    %c0_i32 = arith.constant 0 : i32
    %c0_i32_0 = arith.constant 0 : i32
    return %arg0, %c0_i32 : i32, i32
  }
  func.func @transform_1(%arg0: i32) -> (i32, i32) {
    %c0_i32 = arith.constant 0 : i32
    %c0_i32_0 = arith.constant 0 : i32
    %c0_i32_1 = arith.constant 0 : i32
    return %c0_i32, %c0_i32_0 : i32, i32
  }
  func.func @transform_2(%arg0: i32) -> (i32, i32) {
    %c0_i32 = arith.constant 0 : i32
    %c0_i32_0 = arith.constant 0 : i32
    %c0_i32_1 = arith.constant 0 : i32
    return %c0_i32, %c0_i32_0 : i32, i32
  }
  func.func @transform_3(%arg0: i32) -> (i32, i32) {
    %c0_i32 = arith.constant 0 : i32
    %c0_i32_0 = arith.constant 0 : i32
    %c0_i32_1 = arith.constant 0 : i32
    return %c0_i32, %c0_i32_0 : i32, i32
  }
  func.func @transform_4(%arg0: i32) -> (i32, i32) {
    %c0_i32 = arith.constant 0 : i32
    %c0_i32_0 = arith.constant 0 : i32
    %c0_i32_1 = arith.constant 0 : i32
    return %c0_i32, %c0_i32_0 : i32, i32
  }
  func.func @transform_5(%arg0: i32) -> (i32, i32) {
    %c0_i32 = arith.constant 0 : i32
    %c0_i32_0 = arith.constant 0 : i32
    %c0_i32_1 = arith.constant 0 : i32
    return %c0_i32, %c0_i32_0 : i32, i32
  }
  func.func @transform_6(%arg0: i32) -> (i32, i32) {
    %c0_i32 = arith.constant 0 : i32
    %c0_i32_0 = arith.constant 0 : i32
    %c0_i32_1 = arith.constant 0 : i32
    return %c0_i32, %c0_i32_0 : i32, i32
  }
  func.func @transform_7(%arg0: i32) -> (i32, i32) {
    %c0_i32 = arith.constant 0 : i32
    %c0_i32_0 = arith.constant 0 : i32
    return %arg0, %c0_i32 : i32, i32
  }
}

</mosaic_0001>

<bundles_post_ra>
// kernel: _dnn_forward_impl.1
= control target key start
LH: loop header
LB: loop body
LE: loop exit
PB: predicated region body
PF: predicated region fallthrough
CT: control target
= control target key end

     0   :  { %12 = vsyncpa [#allocation3], 0  ;;  %s828_s0 = inlined_call_operand.hbm [shape: f32[8,32], index: 0, kind: input, shape index: {}]   ;;  %s829_s1 = inlined_call_operand.hbm [shape: f32[32,128], index: 1, kind: input, shape index: {}]   ;;  %s830_s2 = inlined_call_operand.vmem [shape: f32[1,128], index: 2, kind: input, shape index: {}]   ;;  %s831_s3 = inlined_call_operand.hbm [shape: f32[128,128], index: 3, kind: input, shape index: {}]   ;;  %s832_s4 = inlined_call_operand.vmem [shape: f32[1,128], index: 4, kind: input, shape index: {}]   ;;  %s833_s5 = inlined_call_operand.hbm [shape: f32[128,128], index: 5, kind: input, shape index: {}]   ;;  %s834_s6 = inlined_call_operand.vmem [shape: f32[1,128], index: 6, kind: input, shape index: {}]   ;;  %s835_s7 = inlined_call_operand.hbm [shape: f32[8,128], index: 7, kind: output, shape index: {}]  }
   0x1   :  { %13 = vsyncpa [#allocation6], 0 }
   0x2   :  { %14 = vsyncpa [#allocation9], 0 }
   0x3   :  { %15 = vsyncpa [#allocation4], 0  ;;  %s679_s24 = smov [#allocation5]   ;;  %s561_s28 = scalar_lea.hbm %s829_s1, 512 }
   0x4   :  { %s31_s25 = sshll.u32 %s679_s24, 4  ;;  %p562_p0 = scmp.ne.s32.totalorder %s829_s1, %s561_s28  ;;  %s32_s25 = int_to_ptr.vmem [resolvable:$true] %s31_s25 }
   0x5   :  { %p565_p1 = scmp.lt.u32.totalorder %s561_s28, %s829_s1 }
   0x7   :  { %p567_p2 = pnand %p565_p1, %p562_p0 }
   0x9   :  { %570 = shalt.err (!%p567_p2)
}
   0xa   :  { %s571_s10 = scalar_lea.vmem %s32_s25, 512  ;;  %p576_p4 = scmp.lt.s32.totalorder %s32_s25, %s32_s25 }
   0xb   :  { %p572_p3 = scmp.ne.s32.totalorder %s32_s25, %s571_s10  ;;  %p577_p5 = scmp.lt.s32.totalorder %s571_s10, %s571_s10 }
   0xd   :  { %p578_p6 = por %p577_p5, %p576_p4 }
   0xf   :  { %p579_p7 = pnand %p578_p6, %p572_p3 }
  0x11   :  { %582 = shalt.err (!%p579_p7)
}
  0x12   :  { %s680_s11 = smov 128   ;;  %s681_s12 = smov 8  }
  0x13   :  { %37 = dma.hbm_to_vmem [thread:$0]  %s829_s1, 512, %s32_s25, [#allocation6], %s680_s11, %s680_s11, %s681_s12  }
  0x14   :  { %s682_s15 = smov [#allocation2]   ;;  %s683_s17 = smov [#allocation7]  }
  0x15   :  { %s22_s16 = sshll.u32 %s682_s15, 4  ;;  %s45_s18 = sshll.u32 %s683_s17, 4  ;;  %s23_s16 = int_to_ptr.vmem [resolvable:$true] %s22_s16  ;;  %s46_s18 = int_to_ptr.vmem [resolvable:$true] %s45_s18 }
  0x16   :  { %s583_s21 = scalar_lea.hbm %s828_s0, 128 }
  0x17   :  { %p584_p8 = scmp.ne.s32.totalorder %s828_s0, %s583_s21  ;;  %p587_p9 = scmp.lt.u32.totalorder %s583_s21, %s828_s0 }
  0x19   :  { %p589_p10 = pnand %p587_p9, %p584_p8 }
  0x1b   :  { %592 = shalt.err (!%p589_p10)
}
  0x1c   :  { %s593_s1 = scalar_lea.vmem %s23_s16, 128  ;;  %p598_p12 = scmp.lt.s32.totalorder %s23_s16, %s23_s16 }
  0x1d   :  { %p594_p11 = scmp.ne.s32.totalorder %s23_s16, %s593_s1  ;;  %p599_p13 = scmp.lt.s32.totalorder %s593_s1, %s593_s1 }
  0x1f   :  { %p600_p0 = por %p599_p13, %p598_p12 }
  0x21   :  { %p601_p1 = pnand %p600_p0, %p594_p11 }
  0x23   :  { %604 = shalt.err (!%p601_p1)
}
  0x24   :  { %25 = dma.hbm_to_vmem [thread:$0]  %s828_s0, 128, %s23_s16, [#allocation3]  }
  0x25   :  { %s605_s30 = scalar_lea.hbm %s831_s3, 2048 }
  0x26   :  { %p606_p2 = scmp.ne.s32.totalorder %s831_s3, %s605_s30  ;;  %p609_p3 = scmp.lt.u32.totalorder %s605_s30, %s831_s3 }
  0x28   :  { %p611_p4 = pnand %p609_p3, %p606_p2 }
  0x2a   :  { %614 = shalt.err (!%p611_p4)
}
  0x2b   :  { %s615_s14 = scalar_lea.vmem %s46_s18, 2048  ;;  %p620_p6 = scmp.lt.s32.totalorder %s46_s18, %s46_s18 }
  0x2c   :  { %p616_p5 = scmp.ne.s32.totalorder %s46_s18, %s615_s14  ;;  %p621_p7 = scmp.lt.s32.totalorder %s615_s14, %s615_s14 }
  0x2e   :  { %p622_p8 = por %p621_p7, %p620_p6 }
  0x30   :  { %p623_p9 = pnand %p622_p8, %p616_p5 }
  0x32   :  { %626 = shalt.err (!%p623_p9)
}
  0x33   :  { %51 = dma.hbm_to_vmem [thread:$0]  %s831_s3, 2048, %s46_s18, [#allocation6], %s680_s11, %s680_s11, %s681_s12  }
  0x34   :  { %s684_s16 = smov [#allocation8]   ;;  %s627_s21 = scalar_lea.hbm %s833_s5, 2048 }
  0x35   :  { %s59_s17 = sshll.u32 %s684_s16, 4  ;;  %p628_p10 = scmp.ne.s32.totalorder %s833_s5, %s627_s21  ;;  %s60_s17 = int_to_ptr.vmem [resolvable:$true] %s59_s17 }
  0x36   :  { %p631_p11 = scmp.lt.u32.totalorder %s627_s21, %s833_s5 }
  0x38   :  { %p633_p12 = pnand %p631_p11, %p628_p10 }
  0x3a   :  { %636 = shalt.err (!%p633_p12)
}
  0x3b   :  { %s637_s1 = scalar_lea.vmem %s60_s17, 2048  ;;  %p642_p0 = scmp.lt.s32.totalorder %s60_s17, %s60_s17 }
  0x3c   :  { %p638_p13 = scmp.ne.s32.totalorder %s60_s17, %s637_s1  ;;  %p643_p1 = scmp.lt.s32.totalorder %s637_s1, %s637_s1 }
  0x3e   :  { %p644_p2 = por %p643_p1, %p642_p0 }
  0x40   :  { %p645_p3 = pnand %p644_p2, %p638_p13 }
  0x42   :  { %648 = shalt.err (!%p645_p3)
}
  0x43   :  { %65 = dma.hbm_to_vmem [thread:$0]  %s833_s5, 2048, %s60_s17, [#allocation9], %s680_s11, %s680_s11, %s681_s12  }
  0x44   :  { %671 = dma.done.wait [#allocation3], 128  }
  0x45   :  { %672 = vsyncadd [#allocation3], 4294967168 }
  0x46   :  { %673 = dma.done.wait [#allocation6], 2560  }
  0x47   :  { %674 = vsyncadd [#allocation6], 4294964736 }
  0x48   :  { %675 = dma.done.wait [#allocation9], 2048  }
  0x49   :  { %676 = vsyncadd [#allocation9], 4294965248  ;;  %v685_v0 = vmov 0.0|0.0   ;;  %vm686_vm0 = vmmov 0   ;;  %v687_v1 = vmov 0.0   ;;  %v81_v2 = vld [vmem:[#allocation5] sm:$0xff] }
  0x4a   :  { %497 = vmatprep.subr.bf16.mxu0 %v685_v0  ;;  %424 = vmatprep.mubr.msk.f32.mxu0 %vm686_vm0, %v687_v1  ;;  %v82_v3 = vld [vmem:[#allocation5 + $0x8] sm:$0xff]  ;;  %v83_v4 = vld [vmem:[#allocation5 + $0x10] sm:$0xff]  ;;  %v84_v6 = vld [vmem:[#allocation5 + $0x18] sm:$0xff]  ;;  %vm92_vm1 = vcmask 261120   ;;  %s688_s28 = smov [#allocation10]  }
  0x4b   :  { %503 = vmatprep.subr.bf16.mxu1 %v685_v0  ;;  %459 = vmatprep.mubr.msk.f32.mxu1 %vm686_vm0, %v687_v1  ;;  %v498_v5 = vpack.c.bf16 %v82_v3, %v81_v2  ;;  %v167_v7 = vld [vmem:[#allocation7] sm:$0xff]  ;;  %v168_v8 = vld [vmem:[#allocation7 + $0x8] sm:$0xff]  ;;  %v169_v9 = vld [vmem:[#allocation7 + $0x10] sm:$0xff]  ;;  %v501_v11 = vpack.c.bf16 %v84_v6, %v83_v4  ;;  %s362_s29 = sshll.u32 %s688_s28, 4  ;;  %s363_s29 = int_to_ptr.vmem [resolvable:$true] %s362_s29 }
  0x4c   :  { %v170_v10 = vld [vmem:[#allocation7 + $0x18] sm:$0xff]  ;;  %v504_v12 = vpack.c.bf16 %v168_v8, %v167_v7  ;;  %v171_v14 = vld [vmem:[#allocation7 + $0x20] sm:$0xff]  ;;  %v172_v15 = vld [vmem:[#allocation7 + $0x28] sm:$0xff]  ;;  %s649_s30 = scalar_lea.vmem %s363_s29, 128  ;;  %p654_p5 = scmp.lt.s32.totalorder %s363_s29, %s363_s29 }
  0x4d   :  { %499 = vmatpush3.bf16.msra.mxu0 %v498_v5  ;;  %v507_v13 = vpack.c.bf16 %v170_v10, %v169_v9  ;;  %v80_v16 = vld [vmem:[#allocation2] sm:$0xff]  ;;  %v510_v17 = vpack.c.bf16 %v172_v15, %v171_v14  ;;  %v173_v18 = vld [vmem:[#allocation7 + $0x30] sm:$0xff]  ;;  %v175_v21 = vld [vmem:[#allocation7 + $0x40] sm:$0xff]  ;;  %p650_p4 = scmp.ne.s32.totalorder %s363_s29, %s649_s30  ;;  %p655_p6 = scmp.lt.s32.totalorder %s649_s30, %s649_s30 }
  0x4e   :  { %500 = vmatprep.subr.bf16.mxu0 %v685_v0  ;;  %505 = vmatpush3.bf16.msra.mxu1 %v504_v12  ;;  %v174_v19 = vld [vmem:[#allocation7 + $0x38] sm:$0xff]  ;;  %v176_v22 = vld [vmem:[#allocation7 + $0x48] sm:$0xff]  ;;  %v177_v24 = vld [vmem:[#allocation7 + $0x50] sm:$0xff] }
  0x4f   :  { %506 = vmatprep.subr.bf16.mxu1 %v685_v0  ;;  %v513_v20 = vpack.c.bf16 %v174_v19, %v173_v18  ;;  %v516_v23 = vpack.c.bf16 %v176_v22, %v175_v21  ;;  %v178_v25 = vld [vmem:[#allocation7 + $0x58] sm:$0xff]  ;;  %v179_v27 = vld [vmem:[#allocation7 + $0x60] sm:$0xff]  ;;  %v180_v28 = vld [vmem:[#allocation7 + $0x68] sm:$0xff]  ;;  %p656_p7 = por %p655_p6, %p654_p5 }
  0x50   :  { %v519_v26 = vpack.c.bf16 %v178_v25, %v177_v24  ;;  %v522_v29 = vpack.c.bf16 %v180_v28, %v179_v27  ;;  %v181_v30 = vld [vmem:[#allocation7 + $0x70] sm:$0xff]  ;;  %v182_v31 = vld [vmem:[#allocation7 + $0x78] sm:$0xff]  ;;  %v261_v33 = vld [vmem:[#allocation8] sm:$0xff] }
  0x51   :  { %502 = vmatpush3.bf16.msra.mxu0 %v501_v11  ;;  %v525_v32 = vpack.c.bf16 %v182_v31, %v181_v30  ;;  %v262_v34 = vld [vmem:[#allocation8 + $0x8] sm:$0xff]  ;;  %v263_v35 = vld [vmem:[#allocation8 + $0x10] sm:$0xff]  ;;  %v264_v37 = vld [vmem:[#allocation8 + $0x18] sm:$0xff]  ;;  %p657_p8 = pnand %p656_p7, %p650_p4 }
  0x52   :  { %527 = vmatprep.subr.bf16.mxu0 %v685_v0  ;;  %508 = vmatpush3.bf16.msra.mxu1 %v507_v13  ;;  %v528_v36 = vpack.c.bf16 %v262_v34, %v261_v33  ;;  %v531_v38 = vpack.c.bf16 %v264_v37, %v263_v35  ;;  %v265_v39 = vld [vmem:[#allocation8 + $0x20] sm:$0xff]  ;;  %v266_v40 = vld [vmem:[#allocation8 + $0x28] sm:$0xff]  ;;  %v267_v42 = vld [vmem:[#allocation8 + $0x30] sm:$0xff] }
  0x53   :  { %509 = vmatprep.subr.bf16.mxu1 %v685_v0  ;;  %v534_v41 = vpack.c.bf16 %v266_v40, %v265_v39  ;;  %v268_v43 = vld [vmem:[#allocation8 + $0x38] sm:$0xff]  ;;  %v269_v45 = vld [vmem:[#allocation8 + $0x40] sm:$0xff]  ;;  %v270_v46 = vld [vmem:[#allocation8 + $0x48] sm:$0xff] }
  0x54   :  { %425 = vmatmul.mubr.msk.f32.vlgmr.msra.gmra.mrb[0].mxu0 %vm92_vm1, %v80_v16  ;;  %v537_v44 = vpack.c.bf16 %v268_v43, %v267_v42  ;;  %v540_v47 = vpack.c.bf16 %v270_v46, %v269_v45  ;;  %v271_v48 = vld [vmem:[#allocation8 + $0x50] sm:$0xff]  ;;  %v272_v49 = vld [vmem:[#allocation8 + $0x58] sm:$0xff]  ;;  %v273_v51 = vld [vmem:[#allocation8 + $0x60] sm:$0xff] }
  0x55   :  { %494 = vmatprep.mubr.msk.f32.mxu0 %vm686_vm0, %v687_v1  ;;  %529 = vmatpush3.bf16.msra.mxu0 %v528_v36  ;;  %v543_v50 = vpack.c.bf16 %v272_v49, %v271_v48  ;;  %v274_v52 = vld [vmem:[#allocation8 + $0x68] sm:$0xff]  ;;  %v373_v54 = vld [vmem:[%s830_s2] ss:$0 sm:$0xff]  ;;  %v275_v59 = vld [vmem:[#allocation8 + $0x70] sm:$0xff] }
  0x56   :  { %511 = vmatpush3.bf16.msra.mxu1 %v510_v17  ;;  %530 = vmatprep.subr.bf16.mxu0 %v685_v0  ;;  %v546_v53 = vpack.c.bf16 %v274_v52, %v273_v51  ;;  %v276_v60 = vld [vmem:[#allocation8 + $0x78] sm:$0xff] }
  0x57   :  { %512 = vmatprep.subr.bf16.mxu1 %v685_v0  ;;  %v549_v61 = vpack.c.bf16 %v276_v60, %v275_v59  ;;  %v375_v62 = vld [vmem:[%s832_s4] ss:$0 sm:$0xff] }
  0x58   :  { %v376_v3 = vld [vmem:[%s834_s6] ss:$0 sm:$0xff] }
  0x59   :  { %532 = vmatpush3.bf16.msra.mxu0 %v531_v38 }
  0x5a   :  { %514 = vmatpush3.bf16.msra.mxu1 %v513_v20  ;;  %533 = vmatprep.subr.bf16.mxu0 %v685_v0 }
  0x5b   :  { %515 = vmatprep.subr.bf16.mxu1 %v685_v0 }
  0x5d   :  { %535 = vmatpush3.bf16.msra.mxu0 %v534_v41 }
  0x5e   :  { %517 = vmatpush3.bf16.msra.mxu1 %v516_v23  ;;  %536 = vmatprep.subr.bf16.mxu0 %v685_v0 }
  0x5f   :  { %518 = vmatprep.subr.bf16.mxu1 %v685_v0 }
  0x61   :  { %538 = vmatpush3.bf16.msra.mxu0 %v537_v44 }
  0x62   :  { %520 = vmatpush3.bf16.msra.mxu1 %v519_v26  ;;  %539 = vmatprep.subr.bf16.mxu0 %v685_v0 }
  0x63   :  { %521 = vmatprep.subr.bf16.mxu1 %v685_v0 }
  0x65   :  { %541 = vmatpush3.bf16.msra.mxu0 %v540_v47 }
  0x66   :  { %523 = vmatpush3.bf16.msra.mxu1 %v522_v29  ;;  %542 = vmatprep.subr.bf16.mxu0 %v685_v0 }
  0x67   :  { %524 = vmatprep.subr.bf16.mxu1 %v685_v0 }
  0x69   :  { %544 = vmatpush3.bf16.msra.mxu0 %v543_v50 }
  0x6a   :  { %526 = vmatpush3.bf16.msra.mxu1 %v525_v32  ;;  %545 = vmatprep.subr.bf16.mxu0 %v685_v0 }
  0x6d   :  { %547 = vmatpush3.bf16.msra.mxu0 %v546_v53 }
  0x6e   :  { %548 = vmatprep.subr.bf16.mxu0 %v685_v0 }
  0x71   :  { %550 = vmatpush3.bf16.msra.mxu0 %v549_v61 }
 0x127   :  { %v162_v55 = vpop.f32.mrb[0].mxu0 }
 0x128   :  { %v163_v56 = vadd.f32 %v373_v54, %v162_v55  ;;  %v426_v57 = vpop.f32.mrb[1].mxu0 }
 0x12a   :  { %v166_v58 = vmax.f32 %v163_v56, 0.0 }
 0x12c   :  { %460 = vmatmul.mubr.f32.vlgmr.msra.gmra.mrb[0].mxu1 %v166_v58 }
 0x1ff   :  { %v256_v63 = vpop.f32.mrb[0].mxu1 }
 0x200   :  { %v257_v1 = vadd.f32 %v375_v62, %v256_v63  ;;  %v461_v0 = vpop.f32.mrb[1].mxu1 }
 0x202   :  { %v260_v2 = vmax.f32 %v257_v1, 0.0 }
 0x204   :  { %495 = vmatmul.mubr.f32.vlgmr.msra.gmra.mrb[2].mxu0 %v260_v2 }
 0x2d7   :  { %v350_v4 = vpop.f32.mrb[2].mxu0 }
 0x2d8   :  { %v351_v5 = vadd.f32 %v376_v3, %v350_v4  ;;  %v496_v6 = vpop.f32.mrb[3].mxu0 }
 0x2da   :  { %v354_v7 = vmax.f32 %v351_v5, 0.0 }
 0x2dc   :  { %355 = vst [vmem:[#allocation10] sm:$0xff] %v354_v7 }
 0x2dd   :  { %660 = shalt.err (!%p657_p8)
}
 0x2de   :  { %s661_s9 = scalar_lea.hbm %s835_s7, 128 }
 0x2df   :  { %p662_p9 = scmp.ne.s32.totalorder %s835_s7, %s661_s9  ;;  %p665_p10 = scmp.lt.u32.totalorder %s661_s9, %s835_s7 }
 0x2e1   :  { %p667_p11 = pnand %p665_p10, %p662_p9 }
 0x2e3   :  { %670 = shalt.err (!%p667_p11)
}
 0x2e4   :  { %365 = dma.vmem_to_hbm [thread:$0]  %s363_s29, 128, %s835_s7, [#allocation4]  }
 0x2e5   :  { %677 = dma.done.wait [#allocation4], 128  }
 0x2e6   :  { %678 = vsyncadd [#allocation4], 4294967168 }
 0x2e7   :  { %369 = vsyncpa [#allocation3], 1 }
 0x2e8   :  { %370 = vsyncpa [#allocation6], 1 }
 0x2e9   :  { %371 = vsyncpa [#allocation9], 1 }
 0x2ea   :  { %372 = vsyncpa [#allocation4], 1 }

</bundles_post_ra>
